<compile_context>
chip_gen: v7x
topology: tpu7x:2x2x1
jax: 0.10.0
libtpu: 0.0.40
codegen_flags: <defaults>
</compile_context>

<pallas_src>
import functools

import jax
import jax.numpy as jnp
from jax import lax
from jax.experimental import pallas as pl
from jax.experimental.pallas import tpu as pltpu


# ---------------------------------------------------------------------------
# Generation-aware sizing.
# ---------------------------------------------------------------------------
def _tpu_vmem_capacity():
    try:
        return int(pltpu.get_tpu_info().vmem_capacity_bytes)
    except Exception:
        return 64 * 1024 * 1024          # conservative (v7x-safe) fallback


_VMEM_CAP = _tpu_vmem_capacity()
_SMALL_VMEM = _VMEM_CAP < 96 * 2**20                   # v7x-class (64 MiB) part
_TILE_BYTES = (6 if _SMALL_VMEM else 8) * 2**20        # per x block, tiled path
_LANE_CAP = 2048                                       # bounds in-kernel lane-fold unroll
_VMEM_LIMIT_TILED = (48 if _SMALL_VMEM else 72) * 2**20
_VMEM_LIMIT_FUSED = (52 if _SMALL_VMEM else 100) * 2**20
# Fused path keeps ~3-4 x-sized f32 buffers live (input, centered copy, output),
# so gate on x-as-f32 bytes <= ~1/6 of physical VMEM (~10 MiB v7x, ~21 MiB v6e).
_FUSED_LIMIT_BYTES = _VMEM_CAP // 6


def _sublane_unit(dtype):
    # dtype-aware sublane packing: 8 rows/vreg for 4-byte, 16 for 2-byte, 32 for 1-byte.
    return {4: 8, 2: 16, 1: 32}.get(jnp.dtype(dtype).itemsize, 8)


# ---------------------------------------------------------------------------
# Fused single-pass kernels (x resident in VMEM, centered variance).
# ---------------------------------------------------------------------------
def _fused3d_kernel(x_ref, w_ref, b_ref, y_ref, mean_ref, var_ref, *,
                    eps, inv_count):
    x = x_ref[...].astype(jnp.float32)                         # (N, C, L)
    # Batch-axis sums are VPU adds; a single XLU lane reduce per channel.
    mean = jnp.sum(jnp.sum(x, axis=0), axis=1, keepdims=True) * inv_count   # (C, 1)
    xc = x - mean[None]                                        # reused for y
    var = jnp.sum(jnp.sum(xc * xc, axis=0), axis=1, keepdims=True) * inv_count
    var = jnp.maximum(var, 0.0)
    invstd = lax.rsqrt(var + eps)
    scale = w_ref[...] * invstd                                # (C, 1)
    shift = b_ref[...]                                         # (C, 1)
    y_ref[...] = (xc * scale[None] + shift[None]).astype(y_ref.dtype)
    mean_ref[...] = mean
    var_ref[...] = var


def _fused2d_kernel(x_ref, w_ref, b_ref, y_ref, mean_ref, var_ref, *,
                    eps, inv_count):
    x = x_ref[...].astype(jnp.float32)                         # (N, C)
    mean = jnp.sum(x, axis=0, keepdims=True) * inv_count       # (1, C)
    xc = x - mean
    var = jnp.maximum(jnp.sum(xc * xc, axis=0, keepdims=True) * inv_count, 0.0)
    invstd = lax.rsqrt(var + eps)
    scale = w_ref[...] * invstd                                # (1, C)
    y_ref[...] = (xc * scale + b_ref[...]).astype(y_ref.dtype)
    mean_ref[...] = mean
    var_ref[...] = var


def _fused_3d(x, w32, b32, eps, count):
    N, C, L = x.shape
    kernel = functools.partial(_fused3d_kernel, eps=eps, inv_count=1.0 / count)
    y, mean, var = pl.pallas_call(
        kernel,
        out_shape=(jax.ShapeDtypeStruct((N, C, L), x.dtype),
                   jax.ShapeDtypeStruct((C, 1), jnp.float32),
                   jax.ShapeDtypeStruct((C, 1), jnp.float32)),
        compiler_params=pltpu.CompilerParams(
            vmem_limit_bytes=_VMEM_LIMIT_FUSED),
    )(x, w32.reshape(C, 1), b32.reshape(C, 1))
    return y, mean[:, 0], var[:, 0]


def _fused_2d(x, w32, b32, eps, count):
    N, C = x.shape
    kernel = functools.partial(_fused2d_kernel, eps=eps, inv_count=1.0 / count)
    y, mean, var = pl.pallas_call(
        kernel,
        out_shape=(jax.ShapeDtypeStruct((N, C), x.dtype),
                   jax.ShapeDtypeStruct((1, C), jnp.float32),
                   jax.ShapeDtypeStruct((1, C), jnp.float32)),
        compiler_params=pltpu.CompilerParams(
            vmem_limit_bytes=_VMEM_LIMIT_FUSED),
    )(x, w32.reshape(1, C), b32.reshape(1, C))
    return y, mean[0], var[0]


# ---------------------------------------------------------------------------
# Tiled two-pass kernels (large inputs).
# ---------------------------------------------------------------------------
def _stats3d_kernel(x_ref, psum_ref, pssq_ref, *, n_total, l_total, bn, bl, pw):
    """x block: (bn, C, bl).  Lane-dense (1, C, pw) partials, resident across
    the L-block (reduction) grid axis.  All hot-loop adds are VPU ops."""
    @pl.when(pl.program_id(1) == 0)
    def _():
        psum_ref[...] = jnp.zeros_like(psum_ref)
        pssq_ref[...] = jnp.zeros_like(pssq_ref)

    x = x_ref[...].astype(jnp.float32)
    if n_total % bn != 0:                       # mask padded rows in tail block
        n0 = pl.program_id(0) * bn
        idx = lax.broadcasted_iota(jnp.int32, x.shape, 0) + n0
        x = jnp.where(idx < n_total, x, 0.0)
    if l_total % bl != 0:                       # mask padded lanes in tail block
        l0 = pl.program_id(1) * bl
        idx = lax.broadcasted_iota(jnp.int32, x.shape, 2) + l0
        x = jnp.where(idx < l_total, x, 0.0)

    s = jnp.sum(x, axis=0)                      # (C, bl)   VPU adds over batch
    q = jnp.sum(x * x, axis=0)                  # (C, bl)
    if pw != bl:                                # fold lanes into pw-wide groups (VPU)
        acc_s = s[:, 0:pw]
        acc_q = q[:, 0:pw]
        for j in range(1, bl // pw):
            acc_s = acc_s + s[:, j * pw:(j + 1) * pw]
            acc_q = acc_q + q[:, j * pw:(j + 1) * pw]
        s, q = acc_s, acc_q
    psum_ref[...] += s[None]
    pssq_ref[...] += q[None]


def _stats2d_kernel(x_ref, psum_ref, pssq_ref, *, n_total, bm):
    """x block: (bm, C).  Each (parallel) row block writes its own partials."""
    x = x_ref[...].astype(jnp.float32)
    if n_total % bm != 0:
        m0 = pl.program_id(0) * bm
        idx = lax.broadcasted_iota(jnp.int32, x.shape, 0) + m0
        x = jnp.where(idx < n_total, x, 0.0)
    # TODO(synk): for C << 128, fold batch rows into the lane axis (view as
    # (N//k, k*C)) so the partial stores are lane-dense.
    psum_ref[...] = jnp.sum(x, axis=0)[None, None, :]
    pssq_ref[...] = jnp.sum(x * x, axis=0)[None, None, :]


def _norm_kernel(x_ref, scale_ref, shift_ref, o_ref):
    x = x_ref[...].astype(jnp.float32)
    o_ref[...] = (x * scale_ref[...] + shift_ref[...]).astype(o_ref.dtype)


def _stats_3d(x, bn, bl, pw, vmem_limit):
    N, C, L = x.shape
    gn, gl = pl.cdiv(N, bn), pl.cdiv(L, bl)
    kernel = functools.partial(_stats3d_kernel, n_total=N, l_total=L,
                               bn=bn, bl=bl, pw=pw)
    return pl.pallas_call(
        kernel,
        out_shape=(jax.ShapeDtypeStruct((gn, C, pw), jnp.float32),
                   jax.ShapeDtypeStruct((gn, C, pw), jnp.float32)),
        grid=(gn, gl),
        in_specs=[pl.BlockSpec((bn, C, bl), lambda n, l: (n, 0, l))],
        out_specs=(pl.BlockSpec((1, C, pw), lambda n, l: (n, 0, 0)),
                   pl.BlockSpec((1, C, pw), lambda n, l: (n, 0, 0))),
        compiler_params=pltpu.CompilerParams(
            dimension_semantics=("parallel", "arbitrary"),
            vmem_limit_bytes=vmem_limit),
    )(x)


def _stats_2d(x, bm, vmem_limit):
    N, C = x.shape
    gm = pl.cdiv(N, bm)
    kernel = functools.partial(_stats2d_kernel, n_total=N, bm=bm)
    return pl.pallas_call(
        kernel,
        out_shape=(jax.ShapeDtypeStruct((gm, 1, C), jnp.float32),
                   jax.ShapeDtypeStruct((gm, 1, C), jnp.float32)),
        grid=(gm,),
        in_specs=[pl.BlockSpec((bm, C), lambda i: (i, 0))],
        out_specs=(pl.BlockSpec((1, 1, C), lambda i: (i, 0, 0)),
                   pl.BlockSpec((1, 1, C), lambda i: (i, 0, 0))),
        compiler_params=pltpu.CompilerParams(
            dimension_semantics=("parallel",),
            vmem_limit_bytes=vmem_limit),
    )(x)


def _normalize_3d(x, scale, shift, bn, bl, vmem_limit):
    N, C, L = x.shape
    grid = (pl.cdiv(N, bn), pl.cdiv(L, bl))
    blk = pl.BlockSpec((bn, C, bl), lambda n, l: (n, 0, l))
    vec = pl.BlockSpec((1, C, 1), lambda n, l: (0, 0, 0))
    return pl.pallas_call(
        _norm_kernel,
        out_shape=jax.ShapeDtypeStruct((N, C, L), x.dtype),
        grid=grid, in_specs=[blk, vec, vec], out_specs=blk,
        compiler_params=pltpu.CompilerParams(
            dimension_semantics=("parallel", "parallel"),
            vmem_limit_bytes=vmem_limit),
    )(x, scale, shift)


def _normalize_2d(x, scale, shift, bm, vmem_limit):
    N, C = x.shape
    grid = (pl.cdiv(N, bm),)
    blk = pl.BlockSpec((bm, C), lambda i: (i, 0))
    vec = pl.BlockSpec((1, C), lambda i: (0, 0))
    return pl.pallas_call(
        _norm_kernel,
        out_shape=jax.ShapeDtypeStruct((N, C), x.dtype),
        grid=grid, in_specs=[blk, vec, vec], out_specs=blk,
        compiler_params=pltpu.CompilerParams(
            dimension_semantics=("parallel",),
            vmem_limit_bytes=vmem_limit),
    )(x, scale, shift)


# ---------------------------------------------------------------------------
# Tiled (two-pass) drivers.
# ---------------------------------------------------------------------------
def _tiled_3d(x, w32, b32, eps, count, tiles=None):
    N, C, L = x.shape
    itemsize = jnp.dtype(x.dtype).itemsize
    if tiles is None:
        elems = max(1, _TILE_BYTES // itemsize)
        bl_cap = max(128, ((elems // max(C, 1)) // 128) * 128)
        # TODO(synk): very large C (> ~16K f32 channels) should also tile the
        # C axis; currently it relies on full-C blocks.
        cap_l = min(_LANE_CAP, bl_cap)
        bl = L if L <= cap_l else cap_l
        bn = max(1, min(N, elems // max(C * bl, 1)))
        if N >= 2:                      # >= 2 row blocks: megacore / v7x 2-TC split
            bn = min(bn, -(-N // 2))
    else:
        bn, bl = tiles
    pw = 128 if bl % 128 == 0 else bl   # lane width of the partial accumulators

    psum, pssq = _stats_3d(x, bn, bl, pw, _VMEM_LIMIT_TILED)
    total = jnp.sum(psum, axis=(0, 2))
    total_sq = jnp.sum(pssq, axis=(0, 2))
    inv = 1.0 / count
    mean = total * inv
    # TODO(synk): single-pass E[x^2]-E[x]^2 variance loses precision when
    # |mean| >> std; a Welford/two-pass variant would be more robust here.
    var = jnp.maximum(total_sq * inv - mean * mean, 0.0)
    invstd = lax.rsqrt(var + eps)
    scale = (w32 * invstd).reshape(1, C, 1)
    shift = (b32 - mean * w32 * invstd).reshape(1, C, 1)
    y = _normalize_3d(x, scale, shift, bn, bl, _VMEM_LIMIT_TILED)
    return y, mean, var


def _tiled_2d(x, w32, b32, eps, count, tiles=None):
    N, C = x.shape
    itemsize = jnp.dtype(x.dtype).itemsize
    if tiles is None:
        unit = _sublane_unit(x.dtype)
        bm_cap = max(unit, ((_TILE_BYTES // max(itemsize * C, 1)) // unit) * unit)
        bm = min(N, bm_cap)
        if N > unit:                    # keep >= 2 row blocks for megacore sharding
            bm = min(bm, max(unit, ((-(-N // 2)) // unit) * unit))
    else:
        (bm,) = tiles

    psum, pssq = _stats_2d(x, bm, _VMEM_LIMIT_TILED)
    total = jnp.sum(psum, axis=(0, 1))
    total_sq = jnp.sum(pssq, axis=(0, 1))
    inv = 1.0 / count
    mean = total * inv
    var = jnp.maximum(total_sq * inv - mean * mean, 0.0)
    invstd = lax.rsqrt(var + eps)
    scale = (w32 * invstd).reshape(1, C)
    shift = (b32 - mean * w32 * invstd).reshape(1, C)
    y = _normalize_2d(x, scale, shift, bm, _VMEM_LIMIT_TILED)
    return y, mean, var


# ---------------------------------------------------------------------------
# Public forward (training mode): returns (y, new_running_mean, new_running_var).
# ---------------------------------------------------------------------------
@functools.partial(jax.jit, static_argnames=("eps", "momentum"))
def batchnorm1d_forward(x, weight, bias, running_mean, running_var,
                        eps=1e-5, momentum=0.1):
    if x.ndim not in (2, 3):
        raise ValueError(
            "expected 2D or 3D input (got {}D input)".format(x.ndim))
    N = x.shape[0]
    C = x.shape[1]
    count = N * (x.shape[2] if x.ndim == 3 else 1)
    if count <= 1:
        raise ValueError(
            "Expected more than 1 value per channel when training, got input "
            "size {}".format(x.shape))

    w32 = (jnp.ones((C,), jnp.float32) if weight is None
           else weight.astype(jnp.float32))
    b32 = (jnp.zeros((C,), jnp.float32) if bias is None
           else bias.astype(jnp.float32))

    use_fused = (x.size * 4) <= _FUSED_LIMIT_BYTES   # x-as-f32 fits in VMEM

    if x.ndim == 2:
        if use_fused:
            y, mean, var = _fused_2d(x, w32, b32, eps, count)
        else:
            y, mean, var = _tiled_2d(x, w32, b32, eps, count)
    else:
        if use_fused:
            y, mean, var = _fused_3d(x, w32, b32, eps, count)
        else:
            y, mean, var = _tiled_3d(x, w32, b32, eps, count)

    # Running-stat update (PyTorch uses the *unbiased* batch variance here).
    unbiased_var = var * (count / (count - 1))
    new_rm = (1.0 - momentum) * running_mean + momentum * mean
    new_rv = (1.0 - momentum) * running_var + momentum * unbiased_var
    return (y, new_rm.astype(running_mean.dtype),
            new_rv.astype(running_var.dtype))


if __name__ == "__main__":
    key = jax.random.PRNGKey(0)
    k1, k2, k3, k4 = jax.random.split(key, 4)

    # ---- fused path, 3D input (batch=2, channels=4, seq=8) ------------------
    N, C, L = 2, 4, 8
    x3 = jax.random.normal(k1, (N, C, L), dtype=jnp.float32)
    weight = jax.random.uniform(k2, (C,), dtype=jnp.float32)   # reset_parameters()
    bias = jnp.zeros((C,), jnp.float32)
    rm = jnp.zeros((C,), jnp.float32)
    rv = jnp.ones((C,), jnp.float32)
    y3, nrm, nrv = batchnorm1d_forward(x3, weight, bias, rm, rv,
                                       eps=1e-5, momentum=0.1)
    jax.block_until_ready((y3, nrm, nrv))
    m_ref = jnp.mean(x3, axis=(0, 2))
    v_ref = jnp.mean((x3 - m_ref[None, :, None]) ** 2, axis=(0, 2))
    y_ref = ((x3 - m_ref[None, :, None]) * lax.rsqrt(v_ref + 1e-5)[None, :, None]
             * weight[None, :, None] + bias[None, :, None])
    cnt = N * L
    assert jnp.allclose(y3, y_ref, atol=1e-4, rtol=1e-4), "3D fused mismatch"
    assert jnp.allclose(nrm, 0.9 * rm + 0.1 * m_ref, atol=1e-4, rtol=1e-4)
    assert jnp.allclose(nrv, 0.9 * rv + 0.1 * v_ref * cnt / (cnt - 1),
                        atol=1e-4, rtol=1e-4)

    # ---- fused path, 2D input (batch=16, features=8) ------------------------
    N2, C2 = 16, 8
    x2 = jax.random.normal(k3, (N2, C2), dtype=jnp.float32)
    w2 = jnp.full((C2,), 0.5, jnp.float32)
    b2 = jnp.full((C2,), 0.25, jnp.float32)
    y2, _, _ = batchnorm1d_forward(x2, w2, b2, jnp.zeros((C2,), jnp.float32),
                                   jnp.ones((C2,), jnp.float32),
                                   eps=1e-5, momentum=0.1)
    jax.block_until_ready(y2)
    m2 = jnp.mean(x2, axis=0)
    v2 = jnp.mean((x2 - m2) ** 2, axis=0)
    y2_ref = (x2 - m2) * lax.rsqrt(v2 + 1e-5) * w2 + b2
    assert jnp.allclose(y2, y2_ref, atol=1e-4, rtol=1e-4), "2D fused mismatch"

    # ---- tiled two-pass path, exercised directly with masked tail blocks ----
    # N=5 with bn=2 -> 3 row blocks (last partial); L=320 with bl=256 -> 2 lane
    # blocks (last partial) + lane folding to 128-wide partials.
    N3, C3, L3 = 5, 8, 320
    x3b = jax.random.normal(k4, (N3, C3, L3), dtype=jnp.float32) + 3.0
    w3 = jnp.linspace(0.5, 1.5, C3, dtype=jnp.float32)
    b3 = jnp.linspace(-1.0, 1.0, C3, dtype=jnp.float32)
    y3b, m3b, v3b = _tiled_3d(x3b, w3, b3, 1e-5, N3 * L3, tiles=(2, 256))
    jax.block_until_ready((y3b, m3b, v3b))
    m_r3 = jnp.mean(x3b, axis=(0, 2))
    v_r3 = jnp.mean((x3b - m_r3[None, :, None]) ** 2, axis=(0, 2))
    y_r3 = ((x3b - m_r3[None, :, None]) * lax.rsqrt(v_r3 + 1e-5)[None, :, None]
            * w3[None, :, None] + b3[None, :, None])
    assert jnp.allclose(m3b, m_r3, atol=1e-3, rtol=1e-3), "tiled 3D mean mismatch"
    assert jnp.allclose(v3b, v_r3, atol=1e-3, rtol=1e-3), "tiled 3D var mismatch"
    assert jnp.allclose(y3b, y_r3, atol=1e-3, rtol=1e-3), "tiled 3D output mismatch"

    # ---- tiled 2D path with a partial last row block (N=20, bm=8) -----------
    N4, C4 = 20, 8
    x4 = jax.random.normal(k1, (N4, C4), dtype=jnp.float32)
    w4 = jnp.ones((C4,), jnp.float32)
    b4 = jnp.zeros((C4,), jnp.float32)
    y4, m4, v4 = _tiled_2d(x4, w4, b4, 1e-5, N4, tiles=(8,))
    jax.block_until_ready((y4, m4, v4))
    m_r4 = jnp.mean(x4, axis=0)
    v_r4 = jnp.mean((x4 - m_r4) ** 2, axis=0)
    y_r4 = (x4 - m_r4) * lax.rsqrt(v_r4 + 1e-5) * w4 + b4
    assert jnp.allclose(y4, y_r4, atol=1e-3, rtol=1e-3), "tiled 2D output mismatch"

    print("KERNEL_OK")
</pallas_src>

<mosaic_0001>
module attributes {stable_mosaic.version = 11 : i64} {
  func.func @_fused3d_kernel(%arg0: memref<2x4x8xf32, #tpu.memory_space<vmem>>, %arg1: memref<4x1xf32, #tpu.memory_space<vmem>>, %arg2: memref<4x1xf32, #tpu.memory_space<vmem>>, %arg3: memref<2x4x8xf32, #tpu.memory_space<vmem>>, %arg4: memref<4x1xf32, #tpu.memory_space<vmem>>, %arg5: memref<4x1xf32, #tpu.memory_space<vmem>>) attributes {dimension_semantics = [], scalar_prefetch = 0 : i64, scratch_operands = 0 : i64, tpu.core_type = #tpu.core_type<tc>} {
    %c0 = arith.constant 0 : index
    %c0_0 = arith.constant 0 : index
    %c0_1 = arith.constant 0 : index
    %0 = vector.load %arg0[%c0, %c0_0, %c0_1] : memref<2x4x8xf32, #tpu.memory_space<vmem>>, vector<2x4x8xf32>
    %cst = arith.constant dense<0.000000e+00> : vector<4x8xf32>
    %1 = vector.multi_reduction <add>, %0, %cst [0] : vector<2x4x8xf32> to vector<4x8xf32>
    %cst_2 = arith.constant dense<0.000000e+00> : vector<4xf32>
    %2 = vector.multi_reduction <add>, %1, %cst_2 [1] : vector<4x8xf32> to vector<4xf32>
    %3 = vector.shape_cast %2 : vector<4xf32> to vector<4x1xf32>
    %cst_3 = arith.constant 6.250000e-02 : f32
    %4 = vector.broadcast %cst_3 : f32 to vector<4x1xf32>
    %5 = arith.mulf %3, %4 : vector<4x1xf32>
    %6 = vector.shape_cast %5 : vector<4x1xf32> to vector<1x4x1xf32>
    %7 = vector.broadcast %6 : vector<1x4x1xf32> to vector<2x4x8xf32>
    %8 = arith.subf %0, %7 : vector<2x4x8xf32>
    %9 = arith.mulf %8, %8 : vector<2x4x8xf32>
    %cst_4 = arith.constant dense<0.000000e+00> : vector<4x8xf32>
    %10 = vector.multi_reduction <add>, %9, %cst_4 [0] : vector<2x4x8xf32> to vector<4x8xf32>
    %cst_5 = arith.constant dense<0.000000e+00> : vector<4xf32>
    %11 = vector.multi_reduction <add>, %10, %cst_5 [1] : vector<4x8xf32> to vector<4xf32>
    %12 = vector.shape_cast %11 : vector<4xf32> to vector<4x1xf32>
    %cst_6 = arith.constant 6.250000e-02 : f32
    %13 = vector.broadcast %cst_6 : f32 to vector<4x1xf32>
    %14 = arith.mulf %12, %13 : vector<4x1xf32>
    %cst_7 = arith.constant 0.000000e+00 : f32
    %15 = vector.broadcast %cst_7 : f32 to vector<4x1xf32>
    %16 = arith.maximumf %14, %15 : vector<4x1xf32>
    %cst_8 = arith.constant 9.99999974E-6 : f32
    %17 = vector.broadcast %cst_8 : f32 to vector<4x1xf32>
    %18 = arith.addf %16, %17 : vector<4x1xf32>
    %19 = math.rsqrt %18 : vector<4x1xf32>
    %c0_9 = arith.constant 0 : index
    %c0_10 = arith.constant 0 : index
    %20 = vector.load %arg1[%c0_9, %c0_10] : memref<4x1xf32, #tpu.memory_space<vmem>>, vector<4x1xf32>
    %21 = arith.mulf %20, %19 : vector<4x1xf32>
    %c0_11 = arith.constant 0 : index
    %c0_12 = arith.constant 0 : index
    %22 = vector.load %arg2[%c0_11, %c0_12] : memref<4x1xf32, #tpu.memory_space<vmem>>, vector<4x1xf32>
    %23 = vector.shape_cast %21 : vector<4x1xf32> to vector<1x4x1xf32>
    %24 = vector.broadcast %23 : vector<1x4x1xf32> to vector<2x4x8xf32>
    %25 = arith.mulf %8, %24 : vector<2x4x8xf32>
    %26 = vector.shape_cast %22 : vector<4x1xf32> to vector<1x4x1xf32>
    %27 = vector.broadcast %26 : vector<1x4x1xf32> to vector<2x4x8xf32>
    %28 = arith.addf %25, %27 : vector<2x4x8xf32>
    %c0_13 = arith.constant 0 : index
    %c0_14 = arith.constant 0 : index
    %c0_15 = arith.constant 0 : index
    %29 = vector.load %arg3[%c0_13, %c0_14, %c0_15] : memref<2x4x8xf32, #tpu.memory_space<vmem>>, vector<2x4x8xf32>
    tpu.vector_store %arg3[%c0_13, %c0_14, %c0_15], %28 {strides = array<i32>} : memref<2x4x8xf32, #tpu.memory_space<vmem>>, vector<2x4x8xf32>,
    %c0_16 = arith.constant 0 : index
    %c0_17 = arith.constant 0 : index
    %30 = vector.load %arg4[%c0_16, %c0_17] : memref<4x1xf32, #tpu.memory_space<vmem>>, vector<4x1xf32>
    tpu.vector_store %arg4[%c0_16, %c0_17], %5 {strides = array<i32>} : memref<4x1xf32, #tpu.memory_space<vmem>>, vector<4x1xf32>,
    %c0_18 = arith.constant 0 : index
    %c0_19 = arith.constant 0 : index
    %31 = vector.load %arg5[%c0_18, %c0_19] : memref<4x1xf32, #tpu.memory_space<vmem>>, vector<4x1xf32>
    tpu.vector_store %arg5[%c0_18, %c0_19], %16 {strides = array<i32>} : memref<4x1xf32, #tpu.memory_space<vmem>>, vector<4x1xf32>,
    return
  }
}

</mosaic_0001>

<bundles_post_ra>
// kernel: batchnorm1d_forward.1
= control target key start
LH: loop header
LB: loop body
LE: loop exit
PB: predicated region body
PF: predicated region fallthrough
CT: control target
= control target key end

     0   :  { %vm20_vm0 = vcmask 60416   ;;  %s194_s0 = inlined_call_operand.vmem [shape: f32[2,4,8], index: 0, kind: input, shape index: {}]   ;;  %s195_s1 = inlined_call_operand.vmem [shape: f32[4,1], index: 1, kind: input, shape index: {}]   ;;  %s196_s2 = inlined_call_operand.vmem [shape: f32[4,1], index: 2, kind: input, shape index: {}]   ;;  %s197_s3 = inlined_call_operand.hbm [shape: f32[2,4,8], index: 3, kind: output, shape index: {0}]   ;;  %s198_s4 = inlined_call_operand.vmem [shape: f32[4,1], index: 4, kind: output, shape index: {1}]   ;;  %s199_s5 = inlined_call_operand.vmem [shape: f32[4,1], index: 5, kind: output, shape index: {2}]  }
   0x1   :  { %v18_v0 = vld [vmem:[%s194_s0] sm:$0xf]  ;;  %v19_v1 = vld [vmem:[%s194_s0 + $0x4] sm:$0xf] }
   0x2   :  { %v21_v2 = vsel %vm20_vm0, %v18_v0, 0.0  ;;  %v22_v3 = vsel %vm20_vm0, %v19_v1, 0.0 }
   0x3   :  { %11 = vsyncpa [#allocation3], 0  ;;  %v23_v4 = vadd.f32 %v22_v3, %v21_v2  ;;  %vm61_vm1 = vcmask 3072   ;;  %v120_v16 = vmov 0   ;;  %v42_v21 = vld [vmem:[%s195_s1] sm:$0xf] }
   0x4   :  { %92 = vset.pattern.permute.xlu1 %v120_v16  ;;  %93 = vset.pattern.permute.xlu0 %v120_v16  ;;  %v44_v24 = vld [vmem:[%s196_s2] sm:$0xf]  ;;  %s121_s28 = smov [#allocation2]  }
   0x5   :  { %v24_v5 = vsel %vm20_vm0, %v23_v4, 0.0  ;;  %s69_s29 = sshll.u32 %s121_s28, 4  ;;  %s70_s29 = int_to_ptr.vmem [resolvable:$true] %s69_s29 }
   0x6   :  { %25 = vadd.xlane.f32.xlu0 %v24_v5  ;;  %s96_s1 = scalar_lea.vmem %s70_s29, 128  ;;  %p101_p1 = scmp.lt.s32.totalorder %s70_s29, %s70_s29 }
   0x7   :  { %p97_p0 = scmp.ne.s32.totalorder %s70_s29, %s96_s1  ;;  %p102_p2 = scmp.lt.s32.totalorder %s96_s1, %s96_s1 }
   0x9   :  { %p103_p3 = por %p102_p2, %p101_p1 }
   0xb   :  { %p104_p4 = pnand %p103_p3, %p97_p0 }
  0x93   :  { %v26_v6 = vpop.xlane.xlu0 %25 }
  0x94   :  { %v27_v7 = vmul.f32 0.0625, %v26_v6 }
  0x96   :  { %v28_v8 = vsub.f32 %v18_v0, %v27_v7  ;;  %v29_v9 = vsub.f32 %v19_v1, %v27_v7  ;;  %62 = vst.msk [vmem:[%s198_s4] sm:$0xf] %vm61_vm1, %v27_v7 }
  0x98   :  { %v30_v10 = vmul.f32 %v28_v8, %v28_v8  ;;  %v31_v11 = vmul.f32 %v29_v9, %v29_v9 }
  0x9a   :  { %v32_v12 = vsel %vm20_vm0, %v30_v10, 0.0  ;;  %v33_v13 = vsel %vm20_vm0, %v31_v11, 0.0 }
  0x9b   :  { %v34_v14 = vadd.f32 %v33_v13, %v32_v12 }
  0x9d   :  { %v35_v15 = vsel %vm20_vm0, %v34_v14, 0.0 }
  0x9e   :  { %36 = vadd.xlane.f32.xlu0 %v35_v15 }
 0x12b   :  { %v37_v17 = vpop.xlane.xlu0 %36 }
 0x12c   :  { %v38_v18 = vmul.f32 0.0625, %v37_v17 }
 0x12e   :  { %v39_v19 = vmax.f32 %v38_v18, 0.0 }
 0x130   :  { %v40_v20 = vadd.f32 1e-05, %v39_v19  ;;  %63 = vst.msk [vmem:[%s199_s5] sm:$0xf] %vm61_vm1, %v39_v19 }
 0x132   :  { %94 = vrsqrt.f32 %v40_v20 }
 0x13c   :  { %v95_v22 = vpop.eup %94 }
 0x13d   :  { %v43_v23 = vmul.f32 %v95_v22, %v42_v21 }
 0x13f   :  { %47 = vperm.xlu1 %92, %v43_v23  }
 0x143   :  { %54 = vperm.xlu1 %92, %v44_v24  }
 0x1be   :  { %v48_v25 = vpop.permute.xlu1 %47 }
 0x1bf   :  { %v50_v26 = vmul.f32 %v48_v25, %v28_v8  ;;  %v51_v27 = vmul.f32 %v48_v25, %v29_v9 }
 0x1c2   :  { %v55_v28 = vpop.permute.xlu1 %54 }
 0x1c3   :  { %v57_v29 = vadd.f32 %v55_v28, %v50_v26  ;;  %v58_v30 = vadd.f32 %v55_v28, %v51_v27 }
 0x1c5   :  { %59 = vst.msk [vmem:[#allocation2] sm:$0xf] %vm20_vm0, %v57_v29  ;;  %60 = vst.msk [vmem:[#allocation2 + $0x4] sm:$0xf] %vm20_vm0, %v58_v30 }
 0x1c6   :  { %107 = shalt.err (!%p104_p4)
}
 0x1c7   :  { %s108_s30 = scalar_lea.hbm %s197_s3, 128 }
 0x1c8   :  { %p109_p5 = scmp.ne.s32.totalorder %s197_s3, %s108_s30  ;;  %p112_p6 = scmp.lt.u32.totalorder %s108_s30, %s197_s3 }
 0x1ca   :  { %p114_p7 = pnand %p112_p6, %p109_p5 }
 0x1cc   :  { %117 = shalt.err (!%p114_p7)
}
 0x1cd   :  { %s122_s10 = smov 64   ;;  %s123_s11 = smov 4  }
 0x1ce   :  { %75 = dma.vmem_to_hbm [thread:$0]  %s70_s29, 128, %s197_s3, [#allocation3], %s122_s10, %s122_s10, %s123_s11  }
 0x1cf   :  { %118 = dma.done.wait [#allocation3], 128  }
 0x1d0   :  { %119 = vsyncadd [#allocation3], 4294967168 }
 0x1d1   :  { %87 = vsyncpa [#allocation3], 1 }

</bundles_post_ra>
